<compile_context>
chip_gen: v7x
topology: tpu7x:2x2x1
jax: 0.10.0
libtpu: 0.0.40
codegen_flags: <defaults>
</compile_context>

<pallas_src>
import numpy as np
import jax
import jax.numpy as jnp
from jax.experimental import pallas as pl
from jax.experimental.pallas import tpu as pltpu


# ----------------------------------------------------------------------------
# structured-constant builders (plain numpy/JAX glue, run once per weight set)
# ----------------------------------------------------------------------------
def _adaptive_pool_matrix(in_size: int, out_size: int) -> jnp.ndarray:
    """(out_size, in_size) averaging matrix matching nn.AdaptiveAvgPool2d (1D)."""
    m = np.zeros((out_size, in_size), dtype=np.float32)
    for i in range(out_size):
        start = (i * in_size) // out_size
        end = -((-(i + 1) * in_size) // out_size)  # ceil((i+1)*in/out)
        m[i, start:end] = 1.0 / (end - start)
    return jnp.asarray(m)


def _bilinear_matrix(out_size: int, in_size: int) -> jnp.ndarray:
    """(out_size, in_size) 1D bilinear interpolation matrix, align_corners=True."""
    m = np.zeros((out_size, in_size), dtype=np.float32)
    if in_size == 1:
        m[:, 0] = 1.0
        return jnp.asarray(m)
    for o in range(out_size):
        src = o * (in_size - 1) / (out_size - 1) if out_size > 1 else 0.0
        p0 = min(int(np.floor(src)), in_size - 1)
        p1 = min(p0 + 1, in_size - 1)
        frac = src - p0
        m[o, p0] += 1.0 - frac
        m[o, p1] += frac
    return jnp.asarray(m)


def _shift_matrices(p: int) -> jnp.ndarray:
    """(9, P*P, P*P) spatial shift matrices encoding a 3x3 conv with padding=1."""
    s = np.zeros((9, p * p, p * p), dtype=np.float32)
    for dh in range(3):
        for dw in range(3):
            k = dh * 3 + dw
            for pi in range(p):
                for qi in range(p):
                    sp, sq = pi + dh - 1, qi + dw - 1
                    if 0 <= sp < p and 0 <= sq < p:
                        s[k, sp * p + sq, pi * p + qi] = 1.0
    return jnp.asarray(s)


def make_pyramid_block_params(conv_w, bn_scale, bn_bias, *, pool_size,
                              height, width, compute_dtype=jnp.bfloat16,
                              interpolation_mode="bilinear", align_corners=True):
    """Fold pool / conv / BN / upsample structure into small device constants.

    Call once per weight update (review item: hoist constant construction out
    of the per-forward path).
    """
    assert interpolation_mode == "bilinear" and align_corners
    cout, cin, kh, kw = conv_w.shape
    assert (kh, kw) == (3, 3)
    p = pool_size
    pp, hw = p * p, height * width

    ah = _adaptive_pool_matrix(height, p)              # (P, H)
    aw = _adaptive_pool_matrix(width, p)               # (P, W)
    bh = _bilinear_matrix(height, p)                   # (H, P)
    bw = _bilinear_matrix(width, p)                    # (W, P)
    apool_t = jnp.kron(ah, aw).T                       # (HW, PP): pooled = x_sp @ apool_t
    bup_t = jnp.kron(bh, bw).T                         # (PP, HW): out_sp = z_sp @ bup_t
    shifts = _shift_matrices(p)                        # (9, PP, PP)

    # K_small[o, i*PP + s, t] = bn_scale[o] * sum_k W[o,i,k] * S[k, s, t]
    w9 = conv_w.astype(jnp.float32).reshape(cout, cin, 9)   # k = kh*3 + kw
    ksmall = jnp.einsum("oik,kst,o->oist", w9, shifts, bn_scale.astype(jnp.float32))
    ksmall = ksmall.reshape(cout, cin * pp, pp)

    # Per-channel folded BN bias, pre-broadcast along the PP lane axis (f32).
    bias = jnp.broadcast_to(bn_bias.astype(jnp.float32)[:, None, None],
                            (cout, 1, pp))

    return {
        "apool_t": apool_t,                                  # f32, wrapper-side pool
        "ksmall": ksmall.astype(compute_dtype),              # (Cout, Cin*PP, PP)
        "bias": jnp.asarray(bias),                           # (Cout, 1, PP) f32
        "bup_t": bup_t.astype(compute_dtype),                # (PP, HW)
    }


# ----------------------------------------------------------------------------
# Pallas kernel: per output channel c -> conv matmul, bias+ReLU, upsample
# ----------------------------------------------------------------------------
def pyramid_conv_up_kernel(p_ref, k_ref, b_ref, up_ref, o_ref):
    # p_ref:  (N, Cin*PP)       pooled activations (shared across grid steps)
    # k_ref:  (1, Cin*PP, PP)   channel-c folded conv3x3 * BN scale
    # b_ref:  (1, 1, PP)        channel-c folded BN bias (f32)
    # up_ref: (PP, HW)          shared bilinear upsample matrix
    # o_ref:  (1, N, HW)        channel-c output slab (lane-dense, HW % 128 == 0)
    y = jnp.dot(p_ref[...], k_ref[0],
                preferred_element_type=jnp.float32)            # (N, PP) f32
    z = jnp.maximum(y + b_ref[0], 0.0)                         # bias + ReLU on f32
    out = jnp.dot(z.astype(up_ref.dtype), up_ref[...],
                  preferred_element_type=jnp.float32)          # (N, HW) f32
    o_ref[0] = out.astype(o_ref.dtype)


# ----------------------------------------------------------------------------
# forward wrapper (jit this; constants come from make_pyramid_block_params)
# ----------------------------------------------------------------------------
def pyramid_block_forward(x, params):
    n, cin, h, w = x.shape
    hw = h * w
    apool_t = params["apool_t"]          # (HW, PP) f32
    ksmall = params["ksmall"]            # (Cout, Cin*PP, PP)
    bias = params["bias"]                # (Cout, 1, PP) f32
    bup_t = params["bup_t"]              # (PP, HW)
    pp, hw_b = bup_t.shape
    cout = ksmall.shape[0]
    assert hw_b == hw and ksmall.shape[1] == cin * pp
    cdtype = ksmall.dtype

    # Tiny adaptive-pool matmul (f32 accumulate) + flatten to (N, Cin*PP).
    # Kept in the jitted wrapper per review: keeps the kernel weight constant
    # independent of H*W and avoids an in-kernel cross-tile relayout.
    pooled = x.reshape(n * cin, hw).astype(jnp.float32) @ apool_t    # (N*Cin, PP)
    pooled2 = pooled.reshape(n, cin * pp).astype(cdtype)             # (N, Cin*PP)

    out = pl.pallas_call(
        pyramid_conv_up_kernel,
        out_shape=jax.ShapeDtypeStruct((cout, n, hw), x.dtype),
        grid=(cout,),
        in_specs=[
            pl.BlockSpec((n, cin * pp), lambda c: (0, 0)),         # shared activations
            pl.BlockSpec((1, cin * pp, pp), lambda c: (c, 0, 0)),  # per-channel weights
            pl.BlockSpec((1, 1, pp), lambda c: (c, 0, 0)),         # per-channel bias
            pl.BlockSpec((pp, hw), lambda c: (0, 0)),              # shared upsample mat
        ],
        out_specs=pl.BlockSpec((1, n, hw), lambda c: (c, 0, 0)),
        compiler_params=pltpu.CompilerParams(
            dimension_semantics=("parallel",)),   # shards Cout over v7x's 2 TCs
    )(pooled2, ksmall, bias, bup_t)                                  # (Cout, N, HW)

    return jnp.transpose(out.reshape(cout, n, h, w), (1, 0, 2, 3))


# pure-JAX reference (independent formulation) for correctness check
def _reference_forward(x, pool_size, conv_w, bn_scale, bn_bias):
    n, cin, h, w = x.shape
    ah = _adaptive_pool_matrix(h, pool_size)
    aw = _adaptive_pool_matrix(w, pool_size)
    bh = _bilinear_matrix(h, pool_size)
    bw = _bilinear_matrix(w, pool_size)
    pooled = jnp.einsum("ph,nchw,qw->ncpq", ah, x, aw)
    y = jax.lax.conv_general_dilated(
        pooled, conv_w, window_strides=(1, 1), padding=((1, 1), (1, 1)),
        dimension_numbers=("NCHW", "OIHW", "NCHW"))
    z = jax.nn.relu(y * bn_scale[None, :, None, None]
                    + bn_bias[None, :, None, None])
    return jnp.einsum("hp,nopq,wq->nohw", bh, z, bw)


if __name__ == "__main__":
    batch, in_channels, out_channels = 2, 4, 8
    height, width, pool_size = 16, 16, 4

    key = jax.random.PRNGKey(0)
    k1, k2, k3, k4, k5, k6 = jax.random.split(key, 6)
    x = jax.random.normal(k1, (batch, in_channels, height, width), jnp.float32)
    conv_w = 0.1 * jax.random.normal(
        k2, (out_channels, in_channels, 3, 3), jnp.float32)

    # BatchNorm2d parameters + running stats, folded into an eval-mode affine.
    gamma = 1.0 + 0.1 * jax.random.normal(k3, (out_channels,), jnp.float32)
    beta = 0.1 * jax.random.normal(k4, (out_channels,), jnp.float32)
    run_mean = 0.1 * jax.random.normal(k5, (out_channels,), jnp.float32)
    run_var = 1.0 + 0.1 * jax.random.uniform(k6, (out_channels,), jnp.float32)
    eps = 1e-5
    bn_scale = gamma / jnp.sqrt(run_var + eps)
    bn_bias = beta - run_mean * bn_scale

    ref = _reference_forward(x, pool_size, conv_w, bn_scale, bn_bias)
    fwd = jax.jit(pyramid_block_forward)

    # 1) f32 compute path: verifies the kernel math tightly.
    params_f32 = make_pyramid_block_params(
        conv_w, bn_scale, bn_bias, pool_size=pool_size,
        height=height, width=width, compute_dtype=jnp.float32)
    out_f32 = jax.block_until_ready(fwd(x, params_f32))
    assert out_f32.shape == (batch, out_channels, height, width)
    np.testing.assert_allclose(np.asarray(out_f32), np.asarray(ref),
                               rtol=1e-4, atol=1e-4)

    # 2) default perf path: bf16 MXU operands, f32 accumulation.
    params_bf16 = make_pyramid_block_params(
        conv_w, bn_scale, bn_bias, pool_size=pool_size,
        height=height, width=width)  # compute_dtype=bf16
    out_bf16 = jax.block_until_ready(fwd(x, params_bf16))
    assert out_bf16.shape == (batch, out_channels, height, width)
    np.testing.assert_allclose(np.asarray(out_bf16), np.asarray(ref),
                               rtol=2e-2, atol=2e-2)

    print("KERNEL_OK")
</pallas_src>

<mosaic_0001>
module attributes {stable_mosaic.version = 11 : i64} {
  func.func @pyramid_conv_up_kernel(%arg0: i32, %arg1: memref<2x64xf32, #tpu.memory_space<vmem>>, %arg2: memref<1x64x16xf32, #tpu.memory_space<vmem>>, %arg3: memref<1x1x16xf32, #tpu.memory_space<vmem>>, %arg4: memref<16x256xf32, #tpu.memory_space<vmem>>, %arg5: memref<1x2x256xf32, #tpu.memory_space<vmem>>) attributes {dimension_semantics = [#tpu.dimension_semantics<parallel>], iteration_bounds = array<i64: 8>, scalar_prefetch = 0 : i64, scratch_operands = 0 : i64, tpu.core_type = #tpu.core_type<tc>, window_params = [{pipeline_mode = #tpu.pipeline_mode<synchronous>, transform_indices = @transform_0, window_bounds = array<i64: 2, 64>}, {transform_indices = @transform_1, window_bounds = array<i64: 1, 64, 16>}, {transform_indices = @transform_2, window_bounds = array<i64: 1, 1, 16>}, {pipeline_mode = #tpu.pipeline_mode<synchronous>, transform_indices = @transform_3, window_bounds = array<i64: 16, 256>}, {transform_indices = @transform_4, window_bounds = array<i64: 1, 2, 256>}]} {
    %c0 = arith.constant 0 : index
    %c0_0 = arith.constant 0 : index
    %0 = vector.load %arg1[%c0, %c0_0] : memref<2x64xf32, #tpu.memory_space<vmem>>, vector<2x64xf32>
    %c0_1 = arith.constant 0 : index
    %c0_2 = arith.constant 0 : index
    %c0_3 = arith.constant 0 : index
    %1 = vector.load %arg2[%c0_1, %c0_2, %c0_3] : memref<1x64x16xf32, #tpu.memory_space<vmem>>, vector<1x64x16xf32>
    %2 = vector.shape_cast %1 : vector<1x64x16xf32> to vector<64x16xf32>
    %cst = arith.constant dense<0.000000e+00> : vector<2x16xf32>
    %3 = tpu.matmul %0, %2, %cst {dimension_numbers = #tpu.dot_dimension_numbers<[1], [0], [0], [1], [0, 0, 1, 1], [], []>} : vector<2x64xf32>, vector<64x16xf32>, vector<2x16xf32> -> vector<2x16xf32>
    %c0_4 = arith.constant 0 : index
    %c0_5 = arith.constant 0 : index
    %c0_6 = arith.constant 0 : index
    %4 = vector.load %arg3[%c0_4, %c0_5, %c0_6] : memref<1x1x16xf32, #tpu.memory_space<vmem>>, vector<1x1x16xf32>
    %5 = vector.shape_cast %4 : vector<1x1x16xf32> to vector<1x16xf32>
    %6 = vector.broadcast %5 : vector<1x16xf32> to vector<2x16xf32>
    %7 = arith.addf %3, %6 : vector<2x16xf32>
    %cst_7 = arith.constant 0.000000e+00 : f32
    %8 = vector.broadcast %cst_7 : f32 to vector<2x16xf32>
    %9 = arith.maximumf %7, %8 : vector<2x16xf32>
    %c0_8 = arith.constant 0 : index
    %c0_9 = arith.constant 0 : index
    %10 = vector.load %arg4[%c0_8, %c0_9] : memref<16x256xf32, #tpu.memory_space<vmem>>, vector<16x256xf32>
    %cst_10 = arith.constant dense<0.000000e+00> : vector<2x256xf32>
    %11 = tpu.matmul %9, %10, %cst_10 {dimension_numbers = #tpu.dot_dimension_numbers<[1], [0], [0], [1], [0, 0, 1, 1], [], []>} : vector<2x16xf32>, vector<16x256xf32>, vector<2x256xf32> -> vector<2x256xf32>
    %c0_11 = arith.constant 0 : index
    %c0_12 = arith.constant 0 : index
    %c0_13 = arith.constant 0 : index
    %12 = vector.load %arg5[%c0_11, %c0_12, %c0_13] : memref<1x2x256xf32, #tpu.memory_space<vmem>>, vector<1x2x256xf32>
    %13 = vector.shape_cast %12 : vector<1x2x256xf32> to vector<2x256xf32>
    %14 = vector.shape_cast %11 : vector<2x256xf32> to vector<1x2x256xf32>
    tpu.vector_store %arg5[%c0_11, %c0_12, %c0_13], %14 {strides = array<i32>} : memref<1x2x256xf32, #tpu.memory_space<vmem>>, vector<1x2x256xf32>,
    return
  }
  func.func @transform_0(%arg0: i32) -> (i32, i32) {
    %c0_i32 = arith.constant 0 : i32
    %c0_i32_0 = arith.constant 0 : i32
    %c0_i32_1 = arith.constant 0 : i32
    return %c0_i32, %c0_i32_0 : i32, i32
  }
  func.func @transform_1(%arg0: i32) -> (i32, i32, i32) {
    %c0_i32 = arith.constant 0 : i32
    %c0_i32_0 = arith.constant 0 : i32
    %c0_i32_1 = arith.constant 0 : i32
    return %arg0, %c0_i32, %c0_i32_0 : i32, i32, i32
  }
  func.func @transform_2(%arg0: i32) -> (i32, i32, i32) {
    %c0_i32 = arith.constant 0 : i32
    %c0_i32_0 = arith.constant 0 : i32
    %c0_i32_1 = arith.constant 0 : i32
    return %arg0, %c0_i32, %c0_i32_0 : i32, i32, i32
  }
  func.func @transform_3(%arg0: i32) -> (i32, i32) {
    %c0_i32 = arith.constant 0 : i32
    %c0_i32_0 = arith.constant 0 : i32
    %c0_i32_1 = arith.constant 0 : i32
    return %c0_i32, %c0_i32_0 : i32, i32
  }
  func.func @transform_4(%arg0: i32) -> (i32, i32, i32) {
    %c0_i32 = arith.constant 0 : i32
    %c0_i32_0 = arith.constant 0 : i32
    %c0_i32_1 = arith.constant 0 : i32
    return %arg0, %c0_i32, %c0_i32_0 : i32, i32, i32
  }
}

</mosaic_0001>

<bundles_post_ra>
// kernel: pyramid_block_forward.1
= control target key start
LH: loop header
LB: loop body
LE: loop exit
PB: predicated region body
PF: predicated region fallthrough
CT: control target
= control target key end

     0   :  { %s566_s15 = smov 0   ;;  %s606_s0 = inlined_call_operand.vmem [shape: f32[2,64], index: 0, kind: input, shape index: {}]   ;;  %s607_s1 = inlined_call_operand.vmem [shape: f32[8,64,16], index: 1, kind: input, shape index: {}]   ;;  %s608_s2 = inlined_call_operand.vmem [shape: f32[8,1,16], index: 2, kind: input, shape index: {}]   ;;  %s609_s3 = inlined_call_operand.vmem [shape: f32[16,256], index: 3, kind: input, shape index: {}]   ;;  %s610_s4 = inlined_call_operand.vmem [shape: f32[8,2,256], index: 4, kind: output, shape index: {}]  }
   0x1 LB: > { %s458_s16 = sadd.s32 4294967295, %s536_s15   ;;  %p462_p0 = scmp.ge.s32.totalorder %s536_s15, 1  ;;  %s536_s15 = sphi %s566_s15, %s14_s15  }
   0x2   : > { %p170_p1 = scmp.lt.s32.totalorder %s536_s15, 9 }
   0x4   : > { %p171_p2 = pnand %p462_p0, %p170_p1 }
   0x5   : > { %p199_p3 = scmp.lt.s32.totalorder (!%p171_p2), %s458_s16, 7  ;;  %v538_v0 = vmov (!%p171_p2), 0.0|0.0   ;;  %vm539_vm0 = vmmov (!%p171_p2), 0   ;;  %v540_v1 = vmov (!%p171_p2), 0.0   ;;  %v212_v14 = vld [vmem:[%s606_s0] sm:$0x3] (!%p171_p2) }
   0x6   : > { %174 = sbr.rel (%p171_p2) target bundleno = 466 (0x1d2), region = 36  ;;  %503 = vmatprep.subr.bf16.mxu0 (!%p171_p2), %v538_v0  ;;  %500 = vmatprep.mubr.msk.f32.mxu0 (!%p171_p2), %vm539_vm0, %v540_v1  ;;  %vm228_vm1 = vcmask (!%p171_p2), 523264   ;;  %v304_v15 = vld [vmem:[%s609_s3 + $0x8] sm:$0xff] (!%p171_p2)  ;;  %v306_v16 = vld [vmem:[%s609_s3 + $0x18] sm:$0xff] (!%p171_p2)  ;;  %v303_v18 = vld [vmem:[%s609_s3] sm:$0xff] (!%p171_p2)  ;;  %vm307_vm2 = vcmask (!%p171_p2), 130048  }
   0x7   : > { %375 = vmatprep.mubr.f32.mxu1 (!%p171_p2), %v540_v1  ;;  %v515_v17 = vpack.c.bf16 (!%p171_p2), %v306_v16, %v304_v15  ;;  %v305_v19 = vld [vmem:[%s609_s3 + $0x10] sm:$0xff] (!%p171_p2) }
   0x8   : > { %v517_v20 = vpack.c.bf16 (!%p171_p2), %v305_v19, %v303_v18 }
   0x9   : > { %516 = vmatprep.subr.bf16.mxu1 (!%p171_p2), %v515_v17 }
   0xa   : > { %518 = vmatpush1.bf16.msra.mxu1 (!%p171_p2), %v517_v20 }
   0xd   : > { %s612_s16 = smov (!%p199_p3, %s458_s16), 7 }
   0xe   : > { %s473_s17 = sshll.u32 %s612_s16, 6  ;;  %s206_s7 = scalar_lea.vmem %s608_s2, %s612_s16 }
   0xf   : > { %s203_s20 = scalar_lea.vmem %s607_s1, %s473_s17  ;;  %v467_v21 = vld [vmem:[%s206_s7] ss:$0 sm:$0xff]  ;;  %s474_s8 = sshll.u32 %s612_s16, 2 }
  0x10   : > { %v213_v2 = vld [vmem:[%s203_s20] sm:$0xff]  ;;  %v214_v3 = vld [vmem:[%s203_s20 + $0x8] sm:$0xff]  ;;  %v215_v4 = vld [vmem:[%s203_s20 + $0x10] sm:$0xff]  ;;  %s211_s11 = scalar_lea.vmem %s610_s4, %s474_s8 }
  0x11   : > { %v504_v5 = vpack.c.bf16 %v214_v3, %v213_v2  ;;  %v216_v6 = vld [vmem:[%s203_s20 + $0x18] sm:$0xff]  ;;  %v217_v8 = vld [vmem:[%s203_s20 + $0x20] sm:$0xff]  ;;  %v218_v9 = vld [vmem:[%s203_s20 + $0x28] sm:$0xff] }
  0x12   : > { %v507_v7 = vpack.c.bf16 %v216_v6, %v215_v4  ;;  %v510_v10 = vpack.c.bf16 %v218_v9, %v217_v8  ;;  %v219_v11 = vld [vmem:[%s203_s20 + $0x30] sm:$0xff]  ;;  %v220_v12 = vld [vmem:[%s203_s20 + $0x38] sm:$0xff] }
  0x13   : > { %505 = vmatpush3.bf16.msra.mxu0 %v504_v5  ;;  %v513_v13 = vpack.c.bf16 %v220_v12, %v219_v11 }
  0x14   : > { %506 = vmatprep.subr.bf16.mxu0 %v538_v0 }
  0x17   : > { %508 = vmatpush3.bf16.msra.mxu0 %v507_v7 }
  0x18   : > { %509 = vmatprep.subr.bf16.mxu0 %v538_v0 }
  0x1b   : > { %511 = vmatpush3.bf16.msra.mxu0 %v510_v10 }
  0x1c   : > { %512 = vmatprep.subr.bf16.mxu0 %v538_v0 }
  0x1f   : > { %514 = vmatpush3.bf16.msra.mxu0 %v513_v13 }
  0x22   : > { %501 = vmatmul.mubr.msk.f32.vlgmr.msra.gmra.mrb[0].mxu0 %vm228_vm1, %v212_v14 }
  0xf5   : > { %v298_v22 = vpop.f32.mrb[0].mxu0 }
  0xf6   : > { %v299_v23 = vadd.f32 %v467_v21, %v298_v22  ;;  %v502_v24 = vpop.f32.mrb[1].mxu0 }
  0xf8   : > { %v302_v25 = vmax.f32 %v299_v23, 0.0 }
  0xfa   : > { %469 = vmatmul.mubr.msk.f32.vlgmr.msra.gmra.mrb[0].mxu1 %vm307_vm2, %v302_v25 }
 0x1cd   : > { %v377_v26 = vpop.f32.mrb[0].mxu1 }
 0x1ce   : > { %v379_v27 = vpop.f32.mrb[1].mxu1 }
 0x1cf   : > { %v384_v28 = vcombine.low %v377_v26, %v379_v27 }
 0x1d1   : > { %470 = vst.sshfl [vmem:[%s211_s11] sm:$0x33 pattern:$0x76325410] %v384_v28 }
 0x1d2 PF: > { %s14_s15 = sadd.s32 1, %s536_s15  }
 0x1d3   : > { %p11_p4 = scmp.ge.s32.totalorder %s14_s15, 10  }
 0x1d5   :  { %13 = sbr.rel (!%p11_p4) target bundleno = 1 (0x1), region = 69 }

</bundles_post_ra>
